<compile_context>
chip_gen: v5e
topology: v5e:2x2
jax: 0.10.0
libtpu: 0.0.40
codegen_flags: <defaults>
</compile_context>

<pallas_src>
import functools

import jax
import jax.numpy as jnp
from jax.experimental import pallas as pl
from jax.experimental.pallas import tpu as pltpu

_MIB = 1024 * 1024


def _round_up(x, m):
    return ((x + m - 1) // m) * m


def _vmem_budget_bytes():
    """Generation-aware VMEM budget (v5e/v6e: 128 MiB phys, v7x: 64 MiB)."""
    try:
        cap = int(pltpu.get_tpu_info().vmem_capacity_bytes)
    except Exception:
        cap = 64 * _MIB  # conservative (v7x-sized) fallback
    # Use up to 3/4 of physical VMEM for this kernel, capped at 112 MiB.
    return int(min((cap * 3) // 4, 112 * _MIB))


def _tile_footprint(tb, tn, tk, in_bytes, out_bytes, needs_scratch):
    fp = 2 * tb * tk * in_bytes        # X tiles (double buffered)
    fp += 2 * tk * tn * in_bytes       # W^T tiles (double buffered)
    fp += 2 * 8 * tn * 4               # bias tile (tiny)
    fp += 2 * tb * tn * out_bytes      # output block
    if needs_scratch:
        fp += tb * tn * 4              # f32 accumulator scratch
    return fp


def _select_tiles(Bp, Np, Kp, in_bytes, out_bytes, needs_scratch, budget,
                  tile_b, tile_n, tile_k):
    # Defaults sized for large problems; clamp to the (lightly padded) extents.
    if tile_b is None:
        tile_b = 512
    if tile_n is None:
        tile_n = 512
    if tile_k is None:
        tile_k = 2048 if in_bytes == 2 else 1024
    tile_b = min(tile_b, Bp)
    tile_n = min(tile_n, Np)
    tile_k = min(tile_k, Kp)

    def fp():
        return _tile_footprint(tile_b, tile_n, tile_k, in_bytes, out_bytes,
                               needs_scratch)

    # Fit the double-buffered footprint inside the VMEM budget.
    while fp() > budget and tile_k > 128:
        tile_k = max(128, _round_up(tile_k // 2, 128))
    while fp() > budget and (tile_b > 8 or tile_n > 128):
        if tile_n >= tile_b and tile_n > 128:
            tile_n = max(128, _round_up(tile_n // 2, 128))
        else:
            tile_b = max(8, _round_up(tile_b // 2, 8))

    # tile_k must divide the zero-padded Kp exactly (128 always divides).
    while Kp % tile_k != 0:
        tile_k -= 128

    # Guarantee >= 2 parallel grid blocks when the problem allows it, so both
    # v7x TensorCores get work (no effect on 1-TC v5e/v6e beyond a no-op).
    if pl.cdiv(Bp, tile_b) * pl.cdiv(Np, tile_n) < 2:
        if Np >= 2 * 128:
            tile_n = _round_up((Np + 1) // 2, 128)
        elif Bp >= 2 * 8:
            tile_b = _round_up((Bp + 1) // 2, 8)

    return tile_b, tile_n, tile_k


def _linear_kernel_f32out(x_ref, w_ref, b_ref, o_ref):
    """f32 output: accumulate directly into the resident output block."""
    k = pl.program_id(2)

    @pl.when(k == 0)
    def _init():
        # Fold the bias into the accumulator init (no epilogue add).
        o_ref[...] = jnp.broadcast_to(b_ref[...], o_ref.shape)

    o_ref[...] += jnp.dot(x_ref[...], w_ref[...],
                          preferred_element_type=jnp.float32)


def _linear_kernel_acc(x_ref, w_ref, b_ref, o_ref, acc_ref):
    """Non-f32 output: f32 accumulator scratch, cast on the last k step."""
    k = pl.program_id(2)

    @pl.when(k == 0)
    def _init():
        acc_ref[...] = jnp.broadcast_to(b_ref[...].astype(jnp.float32),
                                        acc_ref.shape)

    acc_ref[...] += jnp.dot(x_ref[...], w_ref[...],
                            preferred_element_type=jnp.float32)

    @pl.when(k == pl.num_programs(2) - 1)
    def _finalize():
        o_ref[...] = acc_ref[...].astype(o_ref.dtype)


@functools.partial(
    jax.jit, static_argnames=("use_bf16", "tile_b", "tile_n", "tile_k"))
def mein_layer(x, weight, bias, *, use_bf16=False,
               tile_b=None, tile_n=None, tile_k=None):
    """Pallas-TPU implementation of MeinLayer.forward.

    x:      (B, K)  float32
    weight: (N, K)  float32   (PyTorch Linear layout)
    bias:   (N,)    float32
    returns (B, N)  float32
    """
    B, K = x.shape
    N, K2 = weight.shape
    assert K == K2, "input_features mismatch"

    out_dtype = x.dtype
    in_dtype = jnp.bfloat16 if use_bf16 else x.dtype
    in_bytes = jnp.dtype(in_dtype).itemsize
    out_bytes = jnp.dtype(out_dtype).itemsize
    needs_scratch = out_dtype != jnp.float32

    # Light padding only: B -> x8 (sublane), N -> x128 (lane-dense stores),
    # K -> x128 with zeros (required: padded K contributes 0 to the dot).
    Bp = _round_up(B, 8)
    Np = _round_up(N, 128)
    Kp = _round_up(K, 128)

    budget = _vmem_budget_bytes()
    tile_b, tile_n, tile_k = _select_tiles(
        Bp, Np, Kp, in_bytes, out_bytes, needs_scratch, budget,
        tile_b, tile_n, tile_k)

    # Transpose + pad + (cast) the operands.  Under jit these fuse into a
    # single copy; callers reusing the same weight can hoist this themselves.
    w_t = weight.T                                    # (K, N)
    x_p = x
    if (Bp, Kp) != (B, K):
        x_p = jnp.pad(x_p, ((0, Bp - B), (0, Kp - K)))
    w_p = w_t
    if (Kp, Np) != (K, N):
        w_p = jnp.pad(w_p, ((0, Kp - K), (0, Np - N)))
    if use_bf16:
        # Wrapper-side cast: halves HBM/DMA bytes for X and W^T; MXU still
        # accumulates in f32 so only operand precision changes.
        x_p = x_p.astype(jnp.bfloat16)
        w_p = w_p.astype(jnp.bfloat16)
    bias2d = bias.reshape(1, N).astype(jnp.float32)
    if Np != N:
        bias2d = jnp.pad(bias2d, ((0, 0), (0, Np - N)))

    grid = (pl.cdiv(Bp, tile_b), pl.cdiv(Np, tile_n), Kp // tile_k)

    if needs_scratch:
        kernel = _linear_kernel_acc
        scratch_shapes = [pltpu.VMEM((tile_b, tile_n), jnp.float32)]
    else:
        kernel = _linear_kernel_f32out
        scratch_shapes = []

    out = pl.pallas_call(
        kernel,
        out_shape=jax.ShapeDtypeStruct((Bp, Np), out_dtype),
        grid_spec=pltpu.PrefetchScalarGridSpec(
            num_scalar_prefetch=0,
            grid=grid,
            in_specs=[
                # X tile over (batch, reduction).
                pl.BlockSpec((tile_b, tile_k), lambda i, j, k: (i, k)),
                # W^T tile over (reduction, out_features).
                pl.BlockSpec((tile_k, tile_n), lambda i, j, k: (k, j)),
                # Bias tile over out_features only.
                pl.BlockSpec((1, tile_n), lambda i, j, k: (0, j)),
            ],
            out_specs=pl.BlockSpec((tile_b, tile_n), lambda i, j, k: (i, j)),
            scratch_shapes=scratch_shapes,
        ),
        compiler_params=pltpu.CompilerParams(
            dimension_semantics=("parallel", "parallel", "arbitrary"),
            vmem_limit_bytes=int(budget),
        ),
        cost_estimate=pl.CostEstimate(
            flops=2 * B * N * K,
            transcendentals=0,
            bytes_accessed=in_bytes * (Bp * Kp + Kp * Np) + out_bytes * Bp * Np,
        ),
    )(x_p, w_p, bias2d)

    if (Bp, Np) != (B, N):
        out = out[:B, :N]
    return out


if __name__ == "__main__":
    key = jax.random.PRNGKey(0)
    kx, kw, kb = jax.random.split(key, 3)

    # Small shapes consistent with the module: batch=8, in=32, out=16.
    batch, input_features, output_features = 8, 32, 16
    x = jax.random.uniform(kx, (batch, input_features), dtype=jnp.float32)
    weight = jax.random.uniform(
        kw, (output_features, input_features), dtype=jnp.float32)
    bias = jax.random.uniform(kb, (output_features,), dtype=jnp.float32)

    ref = x @ weight.T + bias

    # f32 path (bit-faithful to the PyTorch module).
    out = jax.block_until_ready(mein_layer(x, weight, bias))
    assert out.shape == (batch, output_features)
    assert jnp.allclose(out, ref, atol=1e-5, rtol=1e-5), "f32 mismatch"

    # Opt-in bf16 MXU-input path (f32 accumulation), looser tolerance.
    out_bf16 = jax.block_until_ready(mein_layer(x, weight, bias, use_bf16=True))
    assert jnp.allclose(out_bf16, ref, atol=1e-1, rtol=2e-2), "bf16 mismatch"

    # A second, awkward shape to exercise light padding and partial edge
    # blocks (B not x8, K not x128, N not x128, >=2 parallel blocks).
    b2, k2, n2 = 100, 200, 300
    k1, k2_, k3 = jax.random.split(jax.random.PRNGKey(1), 3)
    x2 = jax.random.uniform(k1, (b2, k2), dtype=jnp.float32)
    w2 = jax.random.uniform(k2_, (n2, k2), dtype=jnp.float32)
    bi2 = jax.random.uniform(k3, (n2,), dtype=jnp.float32)
    out2 = jax.block_until_ready(mein_layer(x2, w2, bi2))
    ref2 = x2 @ w2.T + bi2
    assert out2.shape == (b2, n2)
    assert jnp.allclose(out2, ref2, atol=1e-4, rtol=1e-5), "padded-shape mismatch"

    print("KERNEL_OK")
</pallas_src>

<mosaic_0001>
module attributes {stable_mosaic.version = 11 : i64} {
  func.func @_linear_kernel_f32out(%arg0: i32, %arg1: i32, %arg2: i32, %arg3: memref<8x128xf32, #tpu.memory_space<vmem>>, %arg4: memref<128x128xf32, #tpu.memory_space<vmem>>, %arg5: memref<1x128xf32, #tpu.memory_space<vmem>>, %arg6: memref<8x128xf32, #tpu.memory_space<vmem>>) attributes {dimension_semantics = [#tpu.dimension_semantics<parallel>, #tpu.dimension_semantics<parallel>, #tpu.dimension_semantics<arbitrary>], iteration_bounds = array<i64: 1, 1, 1>, scalar_prefetch = 0 : i64, scratch_operands = 0 : i64, tpu.core_type = #tpu.core_type<tc>, window_params = [{transform_indices = @transform_0, window_bounds = array<i64: 8, 128>}, {transform_indices = @transform_1, window_bounds = array<i64: 128, 128>}, {transform_indices = @transform_2, window_bounds = array<i64: 1, 128>}, {transform_indices = @transform_3, window_bounds = array<i64: 8, 128>}]} {
    %c0_i32 = arith.constant 0 : i32
    %0 = arith.cmpi eq, %arg2, %c0_i32 : i32
    %1 = arith.extui %0 : i1 to i32
    %c0_i32_0 = arith.constant 0 : i32
    %2 = arith.cmpi ne, %1, %c0_i32_0 : i32
    scf.if %2 {
      %c0_8 = arith.constant 0 : index
      %c0_9 = arith.constant 0 : index
      %9 = vector.load %arg5[%c0_8, %c0_9] : memref<1x128xf32, #tpu.memory_space<vmem>>, vector<1x128xf32>
      %10 = vector.shape_cast %9 : vector<1x128xf32> to vector<1x128xf32>
      %11 = vector.broadcast %10 : vector<1x128xf32> to vector<8x128xf32>
      %c0_10 = arith.constant 0 : index
      %c0_11 = arith.constant 0 : index
      %12 = vector.load %arg6[%c0_10, %c0_11] : memref<8x128xf32, #tpu.memory_space<vmem>>, vector<8x128xf32>
      tpu.vector_store %arg6[%c0_10, %c0_11], %11 {strides = array<i32>} : memref<8x128xf32, #tpu.memory_space<vmem>>, vector<8x128xf32>,
    } else {
    }
    %c0 = arith.constant 0 : index
    %c0_1 = arith.constant 0 : index
    %3 = vector.load %arg6[%c0, %c0_1] : memref<8x128xf32, #tpu.memory_space<vmem>>, vector<8x128xf32>
    %c0_2 = arith.constant 0 : index
    %c0_3 = arith.constant 0 : index
    %4 = vector.load %arg3[%c0_2, %c0_3] : memref<8x128xf32, #tpu.memory_space<vmem>>, vector<8x128xf32>
    %c0_4 = arith.constant 0 : index
    %c0_5 = arith.constant 0 : index
    %5 = vector.load %arg4[%c0_4, %c0_5] : memref<128x128xf32, #tpu.memory_space<vmem>>, vector<128x128xf32>
    %cst = arith.constant dense<0.000000e+00> : vector<8x128xf32>
    %6 = tpu.matmul %4, %5, %cst {dimension_numbers = #tpu.dot_dimension_numbers<[1], [0], [0], [1], [0, 0, 1, 1], [], []>} : vector<8x128xf32>, vector<128x128xf32>, vector<8x128xf32> -> vector<8x128xf32>
    %7 = arith.addf %3, %6 : vector<8x128xf32>
    %c0_6 = arith.constant 0 : index
    %c0_7 = arith.constant 0 : index
    %8 = vector.load %arg6[%c0_6, %c0_7] : memref<8x128xf32, #tpu.memory_space<vmem>>, vector<8x128xf32>
    tpu.vector_store %arg6[%c0_6, %c0_7], %7 {strides = array<i32>} : memref<8x128xf32, #tpu.memory_space<vmem>>, vector<8x128xf32>,
    return
  }
  func.func @transform_0(%arg0: i32, %arg1: i32, %arg2: i32) -> (i32, i32) {
    %c0_i32 = arith.constant 0 : i32
    return %arg0, %arg2 : i32, i32
  }
  func.func @transform_1(%arg0: i32, %arg1: i32, %arg2: i32) -> (i32, i32) {
    %c0_i32 = arith.constant 0 : i32
    return %arg2, %arg1 : i32, i32
  }
  func.func @transform_2(%arg0: i32, %arg1: i32, %arg2: i32) -> (i32, i32) {
    %c0_i32 = arith.constant 0 : i32
    %c0_i32_0 = arith.constant 0 : i32
    return %c0_i32, %arg1 : i32, i32
  }
  func.func @transform_3(%arg0: i32, %arg1: i32, %arg2: i32) -> (i32, i32) {
    %c0_i32 = arith.constant 0 : i32
    return %arg0, %arg1 : i32, i32
  }
}

</mosaic_0001>

<bundles_post_ra>
// kernel: mein_layer.1
= control target key start
LH: loop header
LB: loop body
LE: loop exit
PB: predicated region body
PF: predicated region fallthrough
CT: control target
= control target key end

     0   :  { %s186_s0 = inlined_call_operand.vmem [shape: f32[8,128], index: 0, kind: input, shape index: {}]   ;;  %s187_s1 = inlined_call_operand.vmem [shape: f32[128,128], index: 1, kind: input, shape index: {}]   ;;  %s188_s2 = inlined_call_operand.vmem [shape: f32[1,128], index: 2, kind: input, shape index: {}]   ;;  %s189_s3 = inlined_call_operand.hbm [shape: f32[8,128], index: 3, kind: output, shape index: {}]  }
   0x1   :  { %v41_v0 = vld [vmem:[%s187_s1 + $0x78] sm:$0xff]  ;;  %v40_v1 = vld [vmem:[%s187_s1 + $0x70] sm:$0xff]  ;;  %v39_v2 = vld [vmem:[%s187_s1 + $0x68] sm:$0xff] }
   0x2   :  { %42 = vmatpush.msra.mxu0 %v41_v0  ;;  %v38_v3 = vld [vmem:[%s187_s1 + $0x60] sm:$0xff]  ;;  %v37_v4 = vld [vmem:[%s187_s1 + $0x58] sm:$0xff] }
   0x4   :  { %43 = vmatpush.msra.mxu0 %v40_v1 }
   0x6   :  { %44 = vmatpush.msra.mxu0 %v39_v2 }
   0x7   :  { %8 = vsyncpa [#allocation3], 0  ;;  %v36_v5 = vld [vmem:[%s187_s1 + $0x50] sm:$0xff]  ;;  %v35_v6 = vld [vmem:[%s187_s1 + $0x48] sm:$0xff]  ;;  %s108_s21 = smov [#allocation2]   ;;  %s71_s25 = sshll.u32 %s189_s3, 4  ;;  %s72_s25 = int_to_ptr.hbm [resolvable:$true] %s71_s25 }
   0x8   :  { %45 = vmatpush.msra.mxu0 %v38_v3  ;;  %v34_v7 = vld [vmem:[%s187_s1 + $0x40] sm:$0xff]  ;;  %v33_v8 = vld [vmem:[%s187_s1 + $0x38] sm:$0xff]  ;;  %v32_v9 = vld [vmem:[%s187_s1 + $0x30] sm:$0xff]  ;;  %s69_s22 = sshll.u32 %s108_s21, 4  ;;  %s70_s22 = int_to_ptr.vmem [resolvable:$true] %s69_s22 }
   0x9   :  { %v31_v10 = vld [vmem:[%s187_s1 + $0x28] sm:$0xff]  ;;  %v30_v11 = vld [vmem:[%s187_s1 + $0x20] sm:$0xff]  ;;  %v29_v12 = vld [vmem:[%s187_s1 + $0x18] sm:$0xff] }
   0xa   :  { %46 = vmatpush.msra.mxu0 %v37_v4  ;;  %v28_v13 = vld [vmem:[%s187_s1 + $0x10] sm:$0xff]  ;;  %v27_v14 = vld [vmem:[%s187_s1 + $0x8] sm:$0xff]  ;;  %v26_v15 = vld [vmem:[%s187_s1] sm:$0xff] }
   0xb   :  { %v25_v16 = vld [vmem:[%s186_s0] sm:$0xff] }
   0xc   :  { %47 = vmatpush.msra.mxu0 %v36_v5  ;;  %v81_v17 = vld [vmem:[%s188_s2] ss:$0 sm:$0xff] }
   0xe   :  { %48 = vmatpush.msra.mxu0 %v35_v6 }
  0x10   :  { %49 = vmatpush.msra.mxu0 %v34_v7 }
  0x12   :  { %50 = vmatpush.msra.mxu0 %v33_v8 }
  0x14   :  { %51 = vmatpush.msra.mxu0 %v32_v9 }
  0x16   :  { %52 = vmatpush.msra.mxu0 %v31_v10 }
  0x18   :  { %53 = vmatpush.msra.mxu0 %v30_v11 }
  0x1a   :  { %54 = vmatpush.msra.mxu0 %v29_v12 }
  0x1c   :  { %55 = vmatpush.msra.mxu0 %v28_v13 }
  0x1e   :  { %56 = vmatpush.msra.mxu0 %v27_v14 }
  0x20   :  { %57 = vmatpush.msra.mxu0 %v26_v15 }
  0x21   :  { %58 = vmatmul.f32.vlgmr.msra.gmra.mxu0 %v25_v16 }
  0x9e   :  { %v59_v18 = vpop.f32.mrf.mxu0 }
  0x9f   :  { %v62_v19 = vadd.f32 %v81_v17, %v59_v18 }
  0xa1   :  { %63 = vst [vmem:[#allocation2] sm:$0xff] %v62_v19 }
  0xa2   :  { %74 = dma.vmem_to_hbm [thread:$0]  %s70_s22, 128, %s72_s25, [#allocation3]  }
  0xa3   :  { %106 = dma.done.wait [#allocation3], 128  }
  0xa4   :  { %107 = vsyncadd [#allocation3], 4294967168 }
  0xa5   :  { %79 = vsyncpa [#allocation3], 1 }

</bundles_post_ra>
